<compile_context>
chip_gen: v7x
topology: tpu7x:2x2x1
jax: 0.10.0
libtpu: 0.0.40
codegen_flags: <defaults>
</compile_context>

<pallas_src>
import jax
import jax.numpy as jnp
from jax.experimental import pallas as pl
from jax.experimental.pallas import tpu as pltpu


def _round_up(n, m):
    return ((n + m - 1) // m) * m


def _dqn_mlp_kernel(x_ref, w1_ref, b1_ref, w2_ref, b2_ref, w3_ref, b3_ref, o_ref):
    x = x_ref[...]                         # [4, TB]   (batch on lanes)
    w1 = w1_ref[...]                       # [24, 4]

    # ---- Layer 1: K=4 contraction as unrolled broadcast-FMA on the VPU ----
    # (an MXU matmul padded to K=4 wastes >96% of the systolic array and adds
    #  result-FIFO latency for a serially dependent chain of tiny matmuls)
    h1 = b1_ref[...]                       # [24, 1] -> broadcasts over TB lanes
    h1 = (h1
          + w1[:, 0:1] * x[0:1, :]
          + w1[:, 1:2] * x[1:2, :]
          + w1[:, 2:3] * x[2:3, :]
          + w1[:, 3:4] * x[3:4, :])        # [24, TB]
    h1 = jnp.maximum(h1, 0.0)

    # ---- Layer 2 (MXU) ----
    h2 = jnp.dot(w2_ref[...], h1, preferred_element_type=jnp.float32) + b2_ref[...]
    h2 = jnp.maximum(h2, 0.0)              # [24, TB]

    # ---- Output layer (MXU) ----
    out = jnp.dot(w3_ref[...], h2, preferred_element_type=jnp.float32) + b3_ref[...]
    o_ref[...] = out.astype(o_ref.dtype)   # [2, TB]  (lane-dense store)


def dqn_net_forward(x, params, *, batch_tile=1024):
    """x: [B, 4] float32 (PyTorch layout). Returns [B, 2] float32."""
    B, F = x.shape
    assert F == 4, "DqnNet expects 4 input features (CartPole state)"

    # Batch tile: multiple of 128 lanes; sized well under the scoped VMEM limit
    # even on v7x (a [4, TB] f32 tile is ~8*TB*4 bytes after sublane padding,
    # double-buffered -> << 32 MiB for TB up to 4096).
    TB = min(batch_tile, _round_up(B, 128))
    TB = _round_up(TB, 128)
    B_pad = _round_up(B, TB)

    # Transposed, zero-padded input: [4, B_pad] so batch sits on the lane axis.
    xt = jnp.zeros((4, B_pad), dtype=jnp.float32).at[:, :B].set(x.T)

    const = lambda i: (0, 0)   # weights / biases resident across all grid steps
    out_t = pl.pallas_call(
        _dqn_mlp_kernel,
        out_shape=jax.ShapeDtypeStruct((2, B_pad), jnp.float32),
        grid=(B_pad // TB,),
        in_specs=[
            pl.BlockSpec((4, TB), lambda i: (0, i)),   # x tile (pipelined)
            pl.BlockSpec((24, 4), const),              # w1
            pl.BlockSpec((24, 1), const),              # b1
            pl.BlockSpec((24, 24), const),             # w2
            pl.BlockSpec((24, 1), const),              # b2
            pl.BlockSpec((2, 24), const),              # w3
            pl.BlockSpec((2, 1), const),               # b3
        ],
        out_specs=pl.BlockSpec((2, TB), lambda i: (0, i)),
        compiler_params=pltpu.CompilerParams(
            # batch tiles are independent -> shard across both TCs on v7x
            dimension_semantics=("parallel",)),
    )(xt, params["w1"], params["b1"], params["w2"], params["b2"],
      params["w3"], params["b3"])

    return out_t[:, :B].T      # back to PyTorch [B, 2] layout (free XLA plumbing)


def init_params(key):
    """PyTorch nn.Linear-style init; weights stored [out, in], biases [out, 1]."""
    dims = [(4, 24), (24, 24), (24, 2)]
    keys = jax.random.split(key, 2 * len(dims))
    params = {}
    for i, (fan_in, fan_out) in enumerate(dims):
        bound = 1.0 / (fan_in ** 0.5)
        params[f"w{i + 1}"] = jax.random.uniform(
            keys[2 * i], (fan_out, fan_in), minval=-bound, maxval=bound,
            dtype=jnp.float32)
        params[f"b{i + 1}"] = jax.random.uniform(
            keys[2 * i + 1], (fan_out, 1), minval=-bound, maxval=bound,
            dtype=jnp.float32)
    return params


def reference_forward(x, params):
    """Plain-JAX reference in the original [B, features] layout."""
    h1 = jnp.maximum(x @ params["w1"].T + params["b1"].T, 0.0)
    h2 = jnp.maximum(h1 @ params["w2"].T + params["b2"].T, 0.0)
    return h2 @ params["w3"].T + params["b3"].T


if __name__ == "__main__":
    key = jax.random.PRNGKey(0)
    pkey, xkey, xkey2 = jax.random.split(key, 3)
    params = init_params(pkey)

    # Small demo shape matching the module: batch=2, 4 CartPole state features.
    x = jax.random.normal(xkey, (2, 4), dtype=jnp.float32)
    out = jax.block_until_ready(dqn_net_forward(x, params))
    ref = reference_forward(x, params)
    assert out.shape == (2, 2)
    assert jnp.allclose(out, ref, atol=1e-5, rtol=1e-5), "mismatch vs JAX reference (B=2)"

    # Exercise the batch grid + padding path (multiple tiles, non-multiple batch).
    x_big = jax.random.normal(xkey2, (300, 4), dtype=jnp.float32)
    out_big = jax.block_until_ready(dqn_net_forward(x_big, params, batch_tile=128))
    ref_big = reference_forward(x_big, params)
    assert out_big.shape == (300, 2)
    assert jnp.allclose(out_big, ref_big, atol=1e-5, rtol=1e-5), "mismatch vs JAX reference (B=300)"

    print("KERNEL_OK")
</pallas_src>

<mosaic_0001>
module attributes {stable_mosaic.version = 11 : i64} {
  func.func @_dqn_mlp_kernel(%arg0: i32, %arg1: memref<4x128xf32, #tpu.memory_space<vmem>>, %arg2: memref<24x4xf32, #tpu.memory_space<vmem>>, %arg3: memref<24x1xf32, #tpu.memory_space<vmem>>, %arg4: memref<24x24xf32, #tpu.memory_space<vmem>>, %arg5: memref<24x1xf32, #tpu.memory_space<vmem>>, %arg6: memref<2x24xf32, #tpu.memory_space<vmem>>, %arg7: memref<2x1xf32, #tpu.memory_space<vmem>>, %arg8: memref<2x128xf32, #tpu.memory_space<vmem>>) attributes {dimension_semantics = [#tpu.dimension_semantics<parallel>], iteration_bounds = array<i64: 1>, scalar_prefetch = 0 : i64, scratch_operands = 0 : i64, tpu.core_type = #tpu.core_type<tc>, window_params = [{transform_indices = @transform_0, window_bounds = array<i64: 4, 128>}, {pipeline_mode = #tpu.pipeline_mode<synchronous>, transform_indices = @transform_1, window_bounds = array<i64: 24, 4>}, {pipeline_mode = #tpu.pipeline_mode<synchronous>, transform_indices = @transform_2, window_bounds = array<i64: 24, 1>}, {pipeline_mode = #tpu.pipeline_mode<synchronous>, transform_indices = @transform_3, window_bounds = array<i64: 24, 24>}, {pipeline_mode = #tpu.pipeline_mode<synchronous>, transform_indices = @transform_4, window_bounds = array<i64: 24, 1>}, {pipeline_mode = #tpu.pipeline_mode<synchronous>, transform_indices = @transform_5, window_bounds = array<i64: 2, 24>}, {pipeline_mode = #tpu.pipeline_mode<synchronous>, transform_indices = @transform_6, window_bounds = array<i64: 2, 1>}, {transform_indices = @transform_7, window_bounds = array<i64: 2, 128>}]} {
    %c0 = arith.constant 0 : index
    %c0_0 = arith.constant 0 : index
    %0 = vector.load %arg1[%c0, %c0_0] : memref<4x128xf32, #tpu.memory_space<vmem>>, vector<4x128xf32>
    %c0_1 = arith.constant 0 : index
    %c0_2 = arith.constant 0 : index
    %1 = vector.load %arg2[%c0_1, %c0_2] : memref<24x4xf32, #tpu.memory_space<vmem>>, vector<24x4xf32>
    %c0_3 = arith.constant 0 : index
    %c0_4 = arith.constant 0 : index
    %2 = vector.load %arg3[%c0_3, %c0_4] : memref<24x1xf32, #tpu.memory_space<vmem>>, vector<24x1xf32>
    %3 = vector.extract_strided_slice %1 {offsets = [0, 0], sizes = [24, 1], strides = [1, 1]} : vector<24x4xf32> to vector<24x1xf32>
    %4 = vector.extract_strided_slice %0 {offsets = [0, 0], sizes = [1, 128], strides = [1, 1]} : vector<4x128xf32> to vector<1x128xf32>
    %5 = vector.broadcast %3 : vector<24x1xf32> to vector<24x128xf32>
    %6 = vector.broadcast %4 : vector<1x128xf32> to vector<24x128xf32>
    %7 = arith.mulf %5, %6 : vector<24x128xf32>
    %8 = vector.broadcast %2 : vector<24x1xf32> to vector<24x128xf32>
    %9 = arith.addf %8, %7 : vector<24x128xf32>
    %10 = vector.extract_strided_slice %1 {offsets = [0, 1], sizes = [24, 1], strides = [1, 1]} : vector<24x4xf32> to vector<24x1xf32>
    %11 = vector.extract_strided_slice %0 {offsets = [1, 0], sizes = [1, 128], strides = [1, 1]} : vector<4x128xf32> to vector<1x128xf32>
    %12 = vector.broadcast %10 : vector<24x1xf32> to vector<24x128xf32>
    %13 = vector.broadcast %11 : vector<1x128xf32> to vector<24x128xf32>
    %14 = arith.mulf %12, %13 : vector<24x128xf32>
    %15 = arith.addf %9, %14 : vector<24x128xf32>
    %16 = vector.extract_strided_slice %1 {offsets = [0, 2], sizes = [24, 1], strides = [1, 1]} : vector<24x4xf32> to vector<24x1xf32>
    %17 = vector.extract_strided_slice %0 {offsets = [2, 0], sizes = [1, 128], strides = [1, 1]} : vector<4x128xf32> to vector<1x128xf32>
    %18 = vector.broadcast %16 : vector<24x1xf32> to vector<24x128xf32>
    %19 = vector.broadcast %17 : vector<1x128xf32> to vector<24x128xf32>
    %20 = arith.mulf %18, %19 : vector<24x128xf32>
    %21 = arith.addf %15, %20 : vector<24x128xf32>
    %22 = vector.extract_strided_slice %1 {offsets = [0, 3], sizes = [24, 1], strides = [1, 1]} : vector<24x4xf32> to vector<24x1xf32>
    %23 = vector.extract_strided_slice %0 {offsets = [3, 0], sizes = [1, 128], strides = [1, 1]} : vector<4x128xf32> to vector<1x128xf32>
    %24 = vector.broadcast %22 : vector<24x1xf32> to vector<24x128xf32>
    %25 = vector.broadcast %23 : vector<1x128xf32> to vector<24x128xf32>
    %26 = arith.mulf %24, %25 : vector<24x128xf32>
    %27 = arith.addf %21, %26 : vector<24x128xf32>
    %cst = arith.constant 0.000000e+00 : f32
    %28 = vector.broadcast %cst : f32 to vector<24x128xf32>
    %29 = arith.maximumf %27, %28 : vector<24x128xf32>
    %c0_5 = arith.constant 0 : index
    %c0_6 = arith.constant 0 : index
    %30 = vector.load %arg4[%c0_5, %c0_6] : memref<24x24xf32, #tpu.memory_space<vmem>>, vector<24x24xf32>
    %cst_7 = arith.constant dense<0.000000e+00> : vector<24x128xf32>
    %31 = tpu.matmul %30, %29, %cst_7 {dimension_numbers = #tpu.dot_dimension_numbers<[1], [0], [0], [1], [0, 0, 1, 1], [], []>} : vector<24x24xf32>, vector<24x128xf32>, vector<24x128xf32> -> vector<24x128xf32>
    %c0_8 = arith.constant 0 : index
    %c0_9 = arith.constant 0 : index
    %32 = vector.load %arg5[%c0_8, %c0_9] : memref<24x1xf32, #tpu.memory_space<vmem>>, vector<24x1xf32>
    %33 = vector.broadcast %32 : vector<24x1xf32> to vector<24x128xf32>
    %34 = arith.addf %31, %33 : vector<24x128xf32>
    %cst_10 = arith.constant 0.000000e+00 : f32
    %35 = vector.broadcast %cst_10 : f32 to vector<24x128xf32>
    %36 = arith.maximumf %34, %35 : vector<24x128xf32>
    %c0_11 = arith.constant 0 : index
    %c0_12 = arith.constant 0 : index
    %37 = vector.load %arg6[%c0_11, %c0_12] : memref<2x24xf32, #tpu.memory_space<vmem>>, vector<2x24xf32>
    %cst_13 = arith.constant dense<0.000000e+00> : vector<2x128xf32>
    %38 = tpu.matmul %37, %36, %cst_13 {dimension_numbers = #tpu.dot_dimension_numbers<[1], [0], [0], [1], [0, 0, 1, 1], [], []>} : vector<2x24xf32>, vector<24x128xf32>, vector<2x128xf32> -> vector<2x128xf32>
    %c0_14 = arith.constant 0 : index
    %c0_15 = arith.constant 0 : index
    %39 = vector.load %arg7[%c0_14, %c0_15] : memref<2x1xf32, #tpu.memory_space<vmem>>, vector<2x1xf32>
    %40 = vector.broadcast %39 : vector<2x1xf32> to vector<2x128xf32>
    %41 = arith.addf %38, %40 : vector<2x128xf32>
    %c0_16 = arith.constant 0 : index
    %c0_17 = arith.constant 0 : index
    %42 = vector.load %arg8[%c0_16, %c0_17] : memref<2x128xf32, #tpu.memory_space<vmem>>, vector<2x128xf32>
    tpu.vector_store %arg8[%c0_16, %c0_17], %41 {strides = array<i32>} : memref<2x128xf32, #tpu.memory_space<vmem>>, vector<2x128xf32>,
    return
  }
  func.func @transform_0(%arg0: i32) -> (i32, i32) {
    %c0_i32 = arith.constant 0 : i32
    %c0_i32_0 = arith.constant 0 : i32
    return %c0_i32, %arg0 : i32, i32
  }
  func.func @transform_1(%arg0: i32) -> (i32, i32) {
    %c0_i32 = arith.constant 0 : i32
    %c0_i32_0 = arith.constant 0 : i32
    %c0_i32_1 = arith.constant 0 : i32
    return %c0_i32, %c0_i32_0 : i32, i32
  }
  func.func @transform_2(%arg0: i32) -> (i32, i32) {
    %c0_i32 = arith.constant 0 : i32
    %c0_i32_0 = arith.constant 0 : i32
    %c0_i32_1 = arith.constant 0 : i32
    return %c0_i32, %c0_i32_0 : i32, i32
  }
  func.func @transform_3(%arg0: i32) -> (i32, i32) {
    %c0_i32 = arith.constant 0 : i32
    %c0_i32_0 = arith.constant 0 : i32
    %c0_i32_1 = arith.constant 0 : i32
    return %c0_i32, %c0_i32_0 : i32, i32
  }
  func.func @transform_4(%arg0: i32) -> (i32, i32) {
    %c0_i32 = arith.constant 0 : i32
    %c0_i32_0 = arith.constant 0 : i32
    %c0_i32_1 = arith.constant 0 : i32
    return %c0_i32, %c0_i32_0 : i32, i32
  }
  func.func @transform_5(%arg0: i32) -> (i32, i32) {
    %c0_i32 = arith.constant 0 : i32
    %c0_i32_0 = arith.constant 0 : i32
    %c0_i32_1 = arith.constant 0 : i32
    return %c0_i32, %c0_i32_0 : i32, i32
  }
  func.func @transform_6(%arg0: i32) -> (i32, i32) {
    %c0_i32 = arith.constant 0 : i32
    %c0_i32_0 = arith.constant 0 : i32
    %c0_i32_1 = arith.constant 0 : i32
    return %c0_i32, %c0_i32_0 : i32, i32
  }
  func.func @transform_7(%arg0: i32) -> (i32, i32) {
    %c0_i32 = arith.constant 0 : i32
    %c0_i32_0 = arith.constant 0 : i32
    return %c0_i32, %arg0 : i32, i32
  }
}

</mosaic_0001>

<bundles_post_ra>
// kernel: tpu_custom_call.1
= control target key start
LH: loop header
LB: loop body
LE: loop exit
PB: predicated region body
PF: predicated region fallthrough
CT: control target
= control target key end

     0   :  { %v443_v2 = vmov 0   ;;  %s562_s0 = inlined_call_operand.vmem [shape: f32[4,128], index: 0, kind: input, shape index: {}]   ;;  %s563_s1 = inlined_call_operand.vmem [shape: f32[24,4], index: 1, kind: input, shape index: {}]   ;;  %s564_s2 = inlined_call_operand.vmem [shape: f32[24,1], index: 2, kind: input, shape index: {}]   ;;  %s565_s3 = inlined_call_operand.vmem [shape: f32[24,24], index: 3, kind: input, shape index: {}]   ;;  %s566_s4 = inlined_call_operand.vmem [shape: f32[24,1], index: 4, kind: input, shape index: {}]   ;;  %s567_s5 = inlined_call_operand.vmem [shape: f32[2,24], index: 5, kind: input, shape index: {}]   ;;  %s568_s6 = inlined_call_operand.vmem [shape: f32[2,1], index: 6, kind: input, shape index: {}]   ;;  %s569_s7 = inlined_call_operand.hbm [shape: f32[2,128], index: 7, kind: output, shape index: {}]  }
   0x1   :  { %v31_v0 = vld [vmem:[%s564_s2] sm:$0xff]  ;;  %405 = vset.pattern.permute.xlu1 %v443_v2  ;;  %404 = vset.pattern.permute.xlu0 %v443_v2 }
   0x2   :  { %v28_v1 = vld [vmem:[%s563_s1] sm:$0xff]  ;;  %58 = vperm.xlu1 %405, %v31_v0  }
   0x3   :  { %36 = vperm.xlu0 %404, %v28_v1  }
   0x4   :  { %12 = vsyncpa [#allocation3], 0  ;;  %v32_v3 = vld [vmem:[%s564_s2 + $0x8] sm:$0xff]  ;;  %v444_v5 = vmov 1   ;;  %v445_v6 = vmov 2   ;;  %v30_v7 = vld [vmem:[%s563_s1 + $0x10] sm:$0xff]  ;;  %v49_v18 = vlaneseq }
   0x5   :  { %v29_v4 = vld [vmem:[%s563_s1 + $0x8] sm:$0xff]  ;;  %v446_v8 = vmov 3   ;;  %v33_v9 = vld [vmem:[%s564_s2 + $0x10] sm:$0xff]  ;;  %v447_v10 = vmov 0.0|0.0   ;;  %vm448_vm0 = vmmov 0   ;;  %v449_v11 = vmov 0.0  }
   0x6   :  { %63 = vperm.xlu1 %405, %v32_v3   ;;  %390 = vmatprep.subr.bf16.mxu0 %v447_v10  ;;  %v146_v12 = vld [vmem:[%s566_s4] sm:$0xff]  ;;  %v147_v13 = vld [vmem:[%s566_s4 + $0x8] sm:$0xff]  ;;  %v148_v14 = vld [vmem:[%s566_s4 + $0x10] sm:$0xff]  ;;  %v50_v21 = vshrl.u32 %v49_v18, 7  ;;  %vm164_vm1 = vcmask 195584   ;;  %s450_s25 = smov [#allocation2]  }
   0x7   :  { %41 = vperm.xlu0 %404, %v29_v4   ;;  %393 = vmatprep.subr.bf16.mxu1 %v447_v10  ;;  %v258_v15 = vld [vmem:[%s568_s6] sm:$0x3]  ;;  %s344_s26 = sshll.u32 %s450_s25, 4  ;;  %s345_s26 = int_to_ptr.vmem [resolvable:$true] %s344_s26 }
   0x8   :  { %372 = vmatprep.mubr.msk.f32.mxu0 %vm448_vm0, %v449_v11  ;;  %387 = vmatprep.mubr.msk.f32.mxu1 %vm448_vm0, %v449_v11  ;;  %v51_v22 = vsub.s32 0, %v50_v21  ;;  %v88_v23 = vsub.s32 1, %v50_v21  ;;  %v27_v26 = vld [vmem:[%s562_s0] sm:$0xf]  ;;  %v110_v27 = vsub.s32 2, %v50_v21  ;;  %v132_v30 = vsub.s32 3, %v50_v21  ;;  %p424_p1 = scmp.lt.s32.totalorder %s345_s26, %s345_s26 }
   0x9   :  { %s419_s27 = scalar_lea.vmem %s345_s26, 32 }
   0xa   :  { %407 = vset.pattern.permute.xlu1 %v444_v5  ;;  %v52_v28 = vrot.slane %v27_v26, %v51_v22  ;;  %v89_v29 = vrot.slane %v27_v26, %v88_v23  ;;  %v111_v34 = vrot.slane %v27_v26, %v110_v27  ;;  %v133_v37 = vrot.slane %v27_v26, %v132_v30  ;;  %v257_v26 = vld [vmem:[%s567_s5] sm:$0x3]  ;;  %p420_p0 = scmp.ne.s32.totalorder %s345_s26, %s419_s27  ;;  %p425_p2 = scmp.lt.s32.totalorder %s419_s27, %s419_s27 }
   0xb   :  { %406 = vset.pattern.permute.xlu0 %v444_v5  ;;  %79 = vperm.xlu1 %407, %v29_v4  }
   0xc   :  { %75 = vperm.xlu0 %406, %v28_v1   ;;  %p426_p3 = por %p425_p2, %p424_p1 }
   0xe   :  { %p427_p4 = pnand %p426_p3, %p420_p0 }
   0xf   :  { %408 = vset.pattern.permute.xlu1 %v445_v6 }
  0x10   :  { %409 = vset.pattern.permute.xlu0 %v445_v6  ;;  %97 = vperm.xlu1 %408, %v28_v1  }
  0x11   :  { %101 = vperm.xlu0 %409, %v29_v4  }
  0x14   :  { %410 = vset.pattern.permute.xlu1 %v443_v2 }
  0x15   :  { %412 = vset.pattern.permute.xlu0 %v446_v8  ;;  %46 = vperm.xlu1 %410, %v30_v7  }
  0x16   :  { %123 = vperm.xlu0 %412, %v29_v4  }
  0x19   :  { %411 = vset.pattern.permute.xlu1 %v446_v8 }
  0x1a   :  { %415 = vset.pattern.permute.xlu0 %v445_v6  ;;  %119 = vperm.xlu1 %411, %v28_v1   ;;  %v143_v6 = vld [vmem:[%s565_s3] sm:$0xff] }
  0x1b   :  { %105 = vperm.xlu0 %415, %v30_v7  }
  0x1e   :  { %413 = vset.pattern.permute.xlu1 %v443_v2 }
  0x1f   :  { %418 = vset.pattern.permute.xlu0 %v443_v2  ;;  %68 = vperm.xlu1 %413, %v33_v9  }
  0x20   :  { %156 = vperm.xlu0 %418, %v147_v13  }
  0x23   :  { %414 = vset.pattern.permute.xlu1 %v444_v5 }
  0x24   :  { %83 = vperm.xlu1 %414, %v30_v7  }
  0x28   :  { %416 = vset.pattern.permute.xlu1 %v446_v8  ;;  %v145_v8 = vld [vmem:[%s565_s3 + $0x10] sm:$0xff] }
  0x29   :  { %127 = vperm.xlu1 %416, %v30_v7   ;;  %v144_v7 = vld [vmem:[%s565_s3 + $0x8] sm:$0xff] }
  0x2d   :  { %417 = vset.pattern.permute.xlu1 %v443_v2 }
  0x2e   :  { %151 = vperm.xlu1 %417, %v146_v12  }
  0x32   :  { %161 = vperm.xlu1 %417, %v148_v14  }
  0x36   :  { %261 = vperm.xlu1 %417, %v258_v15  }
  0x81   :  { %v59_v16 = vpop.permute.xlu1 %58 }
  0x82   :  { %v37_v17 = vpop.permute.xlu0 %36 }
  0x83   :  { %v53_v35 = vmul.f32 %v52_v28, %v37_v17 }
  0x85   :  { %v64_v19 = vpop.permute.xlu1 %63  ;;  %v71_v43 = vadd.f32 %v59_v16, %v53_v35 }
  0x86   :  { %v42_v20 = vpop.permute.xlu0 %41 }
  0x87   :  { %v54_v33 = vmul.f32 %v52_v28, %v42_v20 }
  0x89   :  { %v72_v38 = vadd.f32 %v64_v19, %v54_v33 }
  0x8a   :  { %v80_v24 = vpop.permute.xlu1 %79 }
  0x8b   :  { %v76_v25 = vpop.permute.xlu0 %75  ;;  %v91_v36 = vmul.f32 %v89_v29, %v80_v24 }
  0x8c   :  { %v90_v39 = vmul.f32 %v89_v29, %v76_v25 }
  0x8d   :  { %v94_v44 = vadd.f32 %v91_v36, %v72_v38 }
  0x8e   :  { %v93_v47 = vadd.f32 %v90_v39, %v71_v43 }
  0x8f   :  { %v98_v31 = vpop.permute.xlu1 %97 }
  0x90   :  { %v102_v32 = vpop.permute.xlu0 %101  ;;  %v112_v45 = vmul.f32 %v111_v34, %v98_v31 }
  0x91   :  { %v113_v40 = vmul.f32 %v111_v34, %v102_v32 }
  0x92   :  { %v115_v50 = vadd.f32 %v112_v45, %v93_v47 }
  0x93   :  { %v116_v48 = vadd.f32 %v113_v40, %v94_v44 }
  0x94   :  { %v47_v41 = vpop.permute.xlu1 %46 }
  0x95   :  { %v124_v42 = vpop.permute.xlu0 %123  ;;  %v55_v59 = vmul.f32 %v52_v28, %v47_v41 }
  0x96   :  { %v135_v46 = vmul.f32 %v133_v37, %v124_v42 }
  0x98   :  { %v138_v51 = vadd.f32 %v135_v46, %v116_v48 }
  0x99   :  { %v120_v49 = vpop.permute.xlu1 %119 }
  0x9a   :  { %v134_v52 = vmul.f32 %v133_v37, %v120_v49  ;;  %v141_v54 = vmax.f32 %v138_v51, 0.0  ;;  %v106_v58 = vpop.permute.xlu0 %105 }
  0x9b   :  { %v114_v63 = vmul.f32 %v111_v34, %v106_v58 }
  0x9c   :  { %v137_v53 = vadd.f32 %v134_v52, %v115_v50 }
  0x9e   :  { %v140_v55 = vmax.f32 %v137_v53, 0.0  ;;  %v69_v56 = vpop.permute.xlu1 %68 }
  0x9f   :  { %v73_v61 = vadd.f32 %v69_v56, %v55_v59  ;;  %v157_v13 = vpop.permute.xlu0 %156 }
  0xa0   :  { %v391_v57 = vpack.c.bf16 %v141_v54, %v140_v55 }
  0xa2   :  { %392 = vmatpush3.bf16.msra.mxu0 %v391_v57 }
  0xa3   :  { %v84_v60 = vpop.permute.xlu1 %83  ;;  %370 = vmatprep.subr.mxu0 %v449_v11 }
  0xa4   :  { %v92_v62 = vmul.f32 %v89_v29, %v84_v60 }
  0xa6   :  { %v95_v0 = vadd.f32 %v92_v62, %v73_v61 }
  0xa8   :  { %v117_v1 = vadd.f32 %v114_v63, %v95_v0  ;;  %v128_v2 = vpop.permute.xlu1 %127 }
  0xa9   :  { %v136_v3 = vmul.f32 %v133_v37, %v128_v2 }
  0xab   :  { %v139_v4 = vadd.f32 %v136_v3, %v117_v1 }
  0xad   :  { %v142_v5 = vmax.f32 %v139_v4, 0.0  ;;  %v152_v12 = vpop.permute.xlu1 %151 }
  0xaf   :  { %371 = vmatpush3.msra.mxu0 %v142_v5 }
  0xb0   :  { %373 = vmatmul.mubr.msk.f32.vlgmr.msra.gmra.mrb[0].mxu0 %vm164_vm1, %v143_v6 }
  0xb1   :  { %375 = vmatprep.mubr.msk.f32.mxu0 %vm448_vm0, %v449_v11  ;;  %v162_v20 = vpop.permute.xlu1 %161 }
  0xb4   :  { %376 = vmatmul.mubr.msk.f32.gmra.mrb[2].mxu0 %vm164_vm1, %v144_v7 }
  0xb5   :  { %378 = vmatprep.mubr.msk.f32.mxu0 %vm448_vm0, %v449_v11  ;;  %v262_v27 = vpop.permute.xlu1 %261 }
  0xb8   :  { %379 = vmatmul.mubr.msk.f32.gmra.mrb[4].mxu0 %vm164_vm1, %v145_v8 }
 0x183   :  { %v240_v9 = vpop.f32.mrb[0].mxu0 }
 0x184   :  { %v374_v10 = vpop.f32.mrb[1].mxu0  ;;  %v241_v14 = vadd.f32 %v240_v9, %v152_v12 }
 0x186   :  { %v254_v18 = vmax.f32 %v241_v14, 0.0 }
 0x187   :  { %v245_v15 = vpop.f32.mrb[2].mxu0 }
 0x188   :  { %v246_v16 = vadd.f32 %v245_v15, %v157_v13  ;;  %v377_v17 = vpop.f32.mrb[3].mxu0 }
 0x18a   :  { %v255_v19 = vmax.f32 %v246_v16, 0.0 }
 0x18b   :  { %v250_v21 = vpop.f32.mrb[4].mxu0 }
 0x18c   :  { %v251_v22 = vadd.f32 %v250_v21, %v162_v20  ;;  %v380_v23 = vpop.f32.mrb[5].mxu0  ;;  %v394_v24 = vpack.c.bf16 %v255_v19, %v254_v18 }
 0x18e   :  { %395 = vmatpush3.bf16.msra.mxu1 %v394_v24  ;;  %v256_v25 = vmax.f32 %v251_v22, 0.0 }
 0x18f   :  { %385 = vmatprep.subr.mxu1 %v449_v11 }
 0x192   :  { %386 = vmatpush3.msra.mxu1 %v256_v25 }
 0x193   :  { %388 = vmatmul.mubr.msk.f32.vlgmr.msra.gmra.mrb[0].mxu1 %vm164_vm1, %v257_v26 }
 0x266   :  { %v333_v28 = vpop.f32.mrb[0].mxu1 }
 0x267   :  { %v334_v29 = vadd.f32 %v333_v28, %v262_v27  ;;  %v389_v30 = vpop.f32.mrb[1].mxu1 }
 0x269   :  { %337 = vst [vmem:[#allocation2] sm:$0x3] %v334_v29 }
 0x26a   :  { %430 = shalt.err (!%p427_p4)
}
 0x26b   :  { %s431_s29 = scalar_lea.hbm %s569_s7, 32 }
 0x26c   :  { %p432_p5 = scmp.ne.s32.totalorder %s569_s7, %s431_s29  ;;  %p435_p6 = scmp.lt.u32.totalorder %s431_s29, %s569_s7 }
 0x26e   :  { %p437_p7 = pnand %p435_p6, %p432_p5 }
 0x270   :  { %440 = shalt.err (!%p437_p7)
}
 0x271   :  { %347 = dma.vmem_to_hbm [thread:$0]  %s345_s26, 32, %s569_s7, [#allocation3]  }
 0x272   :  { %441 = dma.done.wait [#allocation3], 32  }
 0x273   :  { %442 = vsyncadd [#allocation3], 4294967264 }
 0x274   :  { %351 = vsyncpa [#allocation3], 1 }

</bundles_post_ra>
